<compile_context>
chip_gen: v7x
topology: tpu7x:2x2x1
jax: 0.10.0
libtpu: 0.0.40
codegen_flags: <defaults>
</compile_context>

<pallas_src>
import jax
import jax.numpy as jnp
from jax.experimental import pallas as pl
from jax.experimental.pallas import tpu as pltpu

# --- scaled-down config (ModelConfig: d_model=768, heads=8, vocab~30k) ---
B = 2            # batch
S = 8            # decoder sequence length (decoder_max_length=128 in original)
D_MODEL = 32     # cfg.d_model
N_HEADS = 4      # cfg.n_enc_heads
HEAD_DIM = D_MODEL // N_HEADS
D_OUT = 32       # cfg.output_dimensions
VOCAB = 128      # lm head vocab size (synthetic)


# ---------------------------------------------------------------------------
# Fused per-batch kernel: DialogGuidingModule core (masked MHA + projection)
# + T5 lm_head (logits + per-token cross-entropy).
# ---------------------------------------------------------------------------
def neural_empathy_kernel(x_ref, bias_ref, labels_ref,
                          wqkv_ref, wo_ref, bo_ref, wlm_ref, blm_ref,
                          logits_ref, nll_ref, ctx_ref):
    x = x_ref[...]          # [S, D_MODEL]
    bias = bias_ref[...]    # [S, S]   (-1e9 on padded-key positions; mask = ~attention_mask)

    # ---- fused QKV projection: one MXU op; 1/sqrt(HEAD_DIM) is pre-folded into the Q columns ----
    qkv = jnp.dot(x, wqkv_ref[...], preferred_element_type=jnp.float32)   # [S, 3*D_MODEL]

    # ---- per-head masked attention (static unroll; q/k/v are static lane slices) ----
    for h in range(N_HEADS):
        q_h = qkv[:, h * HEAD_DIM:(h + 1) * HEAD_DIM]                                   # [S, HD]
        k_h = qkv[:, D_MODEL + h * HEAD_DIM:D_MODEL + (h + 1) * HEAD_DIM]               # [S, HD]
        v_h = qkv[:, 2 * D_MODEL + h * HEAD_DIM:2 * D_MODEL + (h + 1) * HEAD_DIM]       # [S, HD]

        # scores = q_h @ k_h^T via dot_general contracting the last dims
        # (verified-by-design: no explicit K transpose materialized at these shapes)
        scores = jax.lax.dot_general(
            q_h, k_h, (((1,), (1,)), ((), ())),
            preferred_element_type=jnp.float32) + bias                    # [S, S]

        m = jnp.max(scores, axis=-1, keepdims=True)
        p = jnp.exp(scores - m)                                           # unnormalized
        l = jnp.sum(p, axis=-1, keepdims=True)                            # [S, 1]
        ctx_h = jnp.dot(p, v_h, preferred_element_type=jnp.float32)       # [S, HD]
        # normalize AFTER the PV matmul: [S,HD] multiply instead of [S,S]
        ctx_h = ctx_h * pl.reciprocal(l, approx=True)
        ctx_ref[:, h * HEAD_DIM:(h + 1) * HEAD_DIM] = ctx_h               # concat via scratch

    # ---- output projection over concatenated heads: ONE matmul, K = D_MODEL ----
    knowledge = jnp.dot(ctx_ref[...], wo_ref[...],
                        preferred_element_type=jnp.float32) + bo_ref[...]  # [S, D_OUT]

    # ---- T5 lm_head: logits + per-token cross-entropy (integer labels, no one-hot) ----
    logits = jnp.dot(knowledge, wlm_ref[...],
                     preferred_element_type=jnp.float32) + blm_ref[...]    # [S, VOCAB]
    logits_ref[...] = logits                                               # lane-dense (128)

    m = jnp.max(logits, axis=-1, keepdims=True)
    lse = jnp.log(jnp.sum(jnp.exp(logits - m), axis=-1, keepdims=True)) + m    # [S, 1]
    vocab_iota = jax.lax.broadcasted_iota(jnp.int32, (S, VOCAB), 1)
    picked = jnp.sum(jnp.where(vocab_iota == labels_ref[...], logits, 0.0),
                     axis=-1, keepdims=True)                                   # [S, 1]
    nll_ref[...] = lse - picked                                                # per-token NLL


_fused_call = pl.pallas_call(
    neural_empathy_kernel,
    out_shape=(
        jax.ShapeDtypeStruct((B, S, VOCAB), jnp.float32),   # logits
        jax.ShapeDtypeStruct((B, S, 1), jnp.float32),       # per-token NLL
    ),
    grid_spec=pltpu.PrefetchScalarGridSpec(
        num_scalar_prefetch=0,
        grid=(B,),
        in_specs=[
            pl.BlockSpec((pl.Squeezed(), S, D_MODEL), lambda b: (b, 0, 0)),   # encoded history
            pl.BlockSpec((pl.Squeezed(), S, S), lambda b: (b, 0, 0)),         # key-padding bias
            pl.BlockSpec((pl.Squeezed(), S, 1), lambda b: (b, 0, 0)),         # labels (int32)
            pl.BlockSpec((D_MODEL, 3 * D_MODEL), lambda b: (0, 0)),           # packed W_qkv
            pl.BlockSpec((D_MODEL, D_OUT), lambda b: (0, 0)),                 # W_o
            pl.BlockSpec((1, D_OUT), lambda b: (0, 0)),                       # b_o
            pl.BlockSpec((D_OUT, VOCAB), lambda b: (0, 0)),                   # W_lm
            pl.BlockSpec((1, VOCAB), lambda b: (0, 0)),                       # b_lm
        ],
        out_specs=(
            pl.BlockSpec((pl.Squeezed(), S, VOCAB), lambda b: (b, 0, 0)),
            pl.BlockSpec((pl.Squeezed(), S, 1), lambda b: (b, 0, 0)),
        ),
        scratch_shapes=[pltpu.VMEM((S, D_MODEL), jnp.float32)],               # concat(ctx) scratch
    ),
    compiler_params=pltpu.CompilerParams(
        dimension_semantics=("parallel",)),   # batch axis shards across TCs on v7x
)


# ---------------------------------------------------------------------------
# Parameter init (deterministic, synthetic — no checkpoint loading).
# Q/K/V are packed into one [D_MODEL, 3*D_MODEL] weight; the attention scale
# is folded into the Q columns so the kernel never multiplies scores by it.
# ---------------------------------------------------------------------------
def init_params():
    keys = jax.random.split(jax.random.PRNGKey(42), 5)
    s = 0.02
    wq = s * jax.random.normal(keys[0], (D_MODEL, D_MODEL), jnp.float32)
    wk = s * jax.random.normal(keys[1], (D_MODEL, D_MODEL), jnp.float32)
    wv = s * jax.random.normal(keys[2], (D_MODEL, D_MODEL), jnp.float32)
    wo = s * jax.random.normal(keys[3], (D_MODEL, D_OUT), jnp.float32)
    w_lm = s * jax.random.normal(keys[4], (D_OUT, VOCAB), jnp.float32)

    w_qkv = jnp.concatenate([wq * (HEAD_DIM ** -0.5), wk, wv], axis=1)    # [D_MODEL, 3*D_MODEL]

    return {
        "w_qkv": w_qkv,
        "w_o": wo,                                       # [D_MODEL, D_OUT]
        "b_o": jnp.zeros((1, D_OUT), jnp.float32),
        "w_lm": w_lm,                                    # [D_OUT, VOCAB]
        "b_lm": jnp.zeros((1, VOCAB), jnp.float32),
    }


# ---------------------------------------------------------------------------
# Full forward: NeuralEmpathy.forward numeric path
# ---------------------------------------------------------------------------
def neural_empathy_forward(encoded_history, dec_attention_mask, labels, params):
    """encoded_history: [B,S,D_MODEL] f32 (stands in for decoder_hidden_states[0])
       dec_attention_mask: [B,S] int32 (1=valid, 0=pad); forward uses mask=~attention_mask
       labels: [B,S] int32 token ids (stands in for _prepare_lm_input output)
       returns (logits [B,S,VOCAB], mean loss scalar) ~ Seq2SeqLMOutput"""
    # per-batch key-padding additive bias ([B,S,S]); batch isolation comes from the grid axis
    key_valid = dec_attention_mask != 0                                  # [B, S]
    bias = jnp.where(key_valid[:, None, :], 0.0, -1e9).astype(jnp.float32)
    bias = jnp.broadcast_to(bias, (B, S, S))

    labels3d = labels.astype(jnp.int32)[..., None]                       # [B, S, 1]

    logits, nll = _fused_call(
        encoded_history, bias, labels3d,
        params["w_qkv"], params["w_o"], params["b_o"],
        params["w_lm"], params["b_lm"])

    # mean cross-entropy over all tokens (no -100 ignore positions in this synthetic setup);
    # done in the wrapper because the batch grid axis is "parallel" (no cross-program accumulation).
    loss = jnp.mean(nll)
    return logits, loss


if __name__ == "__main__":
    key = jax.random.PRNGKey(0)
    k1, k2 = jax.random.split(key)

    encoded_history = jax.random.normal(k1, (B, S, D_MODEL), jnp.float32)
    dec_attention_mask = jnp.array(
        [[1, 1, 1, 1, 1, 1, 1, 1],
         [1, 1, 1, 1, 1, 1, 0, 0]], dtype=jnp.int32)            # second item padded
    labels = jax.random.randint(k2, (B, S), 0, VOCAB, dtype=jnp.int32)

    params = init_params()

    forward = jax.jit(neural_empathy_forward)
    logits, loss = forward(encoded_history, dec_attention_mask, labels, params)
    jax.block_until_ready((logits, loss))

    assert logits.shape == (B, S, VOCAB)
    assert jnp.isfinite(loss)
    print("KERNEL_OK")
</pallas_src>

<mosaic_0001>
module attributes {stable_mosaic.version = 11 : i64} {
  func.func @neural_empathy_kernel(%arg0: i32, %arg1: memref<1x8x32xf32, #tpu.memory_space<vmem>>, %arg2: memref<1x8x8xf32, #tpu.memory_space<vmem>>, %arg3: memref<1x8x1xi32, #tpu.memory_space<vmem>>, %arg4: memref<32x96xf32, #tpu.memory_space<vmem>>, %arg5: memref<32x32xf32, #tpu.memory_space<vmem>>, %arg6: memref<1x32xf32, #tpu.memory_space<vmem>>, %arg7: memref<32x128xf32, #tpu.memory_space<vmem>>, %arg8: memref<1x128xf32, #tpu.memory_space<vmem>>, %arg9: memref<1x8x128xf32, #tpu.memory_space<vmem>>, %arg10: memref<1x8x1xf32, #tpu.memory_space<vmem>>, %arg11: memref<8x32xf32, #tpu.memory_space<vmem>>) attributes {dimension_semantics = [#tpu.dimension_semantics<parallel>], iteration_bounds = array<i64: 2>, scalar_prefetch = 0 : i64, scratch_operands = 1 : i64, tpu.core_type = #tpu.core_type<tc>, window_params = [{transform_indices = @transform_0, window_bounds = array<i64: 1, 8, 32>}, {transform_indices = @transform_1, window_bounds = array<i64: 1, 8, 8>}, {transform_indices = @transform_2, window_bounds = array<i64: 1, 8, 1>}, {pipeline_mode = #tpu.pipeline_mode<synchronous>, transform_indices = @transform_3, window_bounds = array<i64: 32, 96>}, {pipeline_mode = #tpu.pipeline_mode<synchronous>, transform_indices = @transform_4, window_bounds = array<i64: 32, 32>}, {pipeline_mode = #tpu.pipeline_mode<synchronous>, transform_indices = @transform_5, window_bounds = array<i64: 1, 32>}, {pipeline_mode = #tpu.pipeline_mode<synchronous>, transform_indices = @transform_6, window_bounds = array<i64: 32, 128>}, {pipeline_mode = #tpu.pipeline_mode<synchronous>, transform_indices = @transform_7, window_bounds = array<i64: 1, 128>}, {transform_indices = @transform_8, window_bounds = array<i64: 1, 8, 128>}, {transform_indices = @transform_9, window_bounds = array<i64: 1, 8, 1>}]} {
    %c0 = arith.constant 0 : index
    %c0_0 = arith.constant 0 : index
    %c0_1 = arith.constant 0 : index
    %0 = vector.load %arg1[%c0, %c0_0, %c0_1] : memref<1x8x32xf32, #tpu.memory_space<vmem>>, vector<1x8x32xf32>
    %1 = vector.shape_cast %0 : vector<1x8x32xf32> to vector<8x32xf32>
    %c0_2 = arith.constant 0 : index
    %c0_3 = arith.constant 0 : index
    %c0_4 = arith.constant 0 : index
    %2 = vector.load %arg2[%c0_2, %c0_3, %c0_4] : memref<1x8x8xf32, #tpu.memory_space<vmem>>, vector<1x8x8xf32>
    %3 = vector.shape_cast %2 : vector<1x8x8xf32> to vector<8x8xf32>
    %c0_5 = arith.constant 0 : index
    %c0_6 = arith.constant 0 : index
    %4 = vector.load %arg4[%c0_5, %c0_6] : memref<32x96xf32, #tpu.memory_space<vmem>>, vector<32x96xf32>
    %cst = arith.constant dense<0.000000e+00> : vector<8x96xf32>
    %5 = tpu.matmul %1, %4, %cst {dimension_numbers = #tpu.dot_dimension_numbers<[1], [0], [0], [1], [0, 0, 1, 1], [], []>} : vector<8x32xf32>, vector<32x96xf32>, vector<8x96xf32> -> vector<8x96xf32>
    %6 = vector.extract_strided_slice %5 {offsets = [0, 0], sizes = [8, 8], strides = [1, 1]} : vector<8x96xf32> to vector<8x8xf32>
    %7 = vector.extract_strided_slice %5 {offsets = [0, 32], sizes = [8, 8], strides = [1, 1]} : vector<8x96xf32> to vector<8x8xf32>
    %8 = vector.extract_strided_slice %5 {offsets = [0, 64], sizes = [8, 8], strides = [1, 1]} : vector<8x96xf32> to vector<8x8xf32>
    %cst_7 = arith.constant dense<0.000000e+00> : vector<8x8xf32>
    %9 = tpu.matmul %6, %7, %cst_7 {dimension_numbers = #tpu.dot_dimension_numbers<[1], [1], [0], [0], [0, 0, 1, 0], [], []>} : vector<8x8xf32>, vector<8x8xf32>, vector<8x8xf32> -> vector<8x8xf32>
    %10 = arith.addf %9, %3 : vector<8x8xf32>
    %cst_8 = arith.constant dense<0xFF800000> : vector<8xf32>
    %11 = vector.multi_reduction <maximumf>, %10, %cst_8 [1] : vector<8x8xf32> to vector<8xf32>
    %12 = vector.shape_cast %11 : vector<8xf32> to vector<8x1xf32>
    %13 = vector.broadcast %12 : vector<8x1xf32> to vector<8x8xf32>
    %14 = arith.subf %10, %13 : vector<8x8xf32>
    %15 = math.exp %14 : vector<8x8xf32>
    %cst_9 = arith.constant dense<0.000000e+00> : vector<8xf32>
    %16 = vector.multi_reduction <add>, %15, %cst_9 [1] : vector<8x8xf32> to vector<8xf32>
    %17 = vector.shape_cast %16 : vector<8xf32> to vector<8x1xf32>
    %cst_10 = arith.constant dense<0.000000e+00> : vector<8x8xf32>
    %18 = tpu.matmul %15, %8, %cst_10 {dimension_numbers = #tpu.dot_dimension_numbers<[1], [0], [0], [1], [0, 0, 1, 1], [], []>} : vector<8x8xf32>, vector<8x8xf32>, vector<8x8xf32> -> vector<8x8xf32>
    %19 = tpu.reciprocal %17 {approx = true} : vector<8x1xf32> -> vector<8x1xf32>
    %20 = vector.broadcast %19 : vector<8x1xf32> to vector<8x8xf32>
    %21 = arith.mulf %18, %20 : vector<8x8xf32>
    %c0_11 = arith.constant 0 : index
    %c0_12 = arith.constant 0 : index
    %22 = vector.load %arg11[%c0_11, %c0_12] : memref<8x32xf32, #tpu.memory_space<vmem>>, vector<8x8xf32>
    tpu.vector_store %arg11[%c0_11, %c0_12], %21 {strides = array<i32>} : memref<8x32xf32, #tpu.memory_space<vmem>>, vector<8x8xf32>,
    %23 = vector.extract_strided_slice %5 {offsets = [0, 8], sizes = [8, 8], strides = [1, 1]} : vector<8x96xf32> to vector<8x8xf32>
    %24 = vector.extract_strided_slice %5 {offsets = [0, 40], sizes = [8, 8], strides = [1, 1]} : vector<8x96xf32> to vector<8x8xf32>
    %25 = vector.extract_strided_slice %5 {offsets = [0, 72], sizes = [8, 8], strides = [1, 1]} : vector<8x96xf32> to vector<8x8xf32>
    %cst_13 = arith.constant dense<0.000000e+00> : vector<8x8xf32>
    %26 = tpu.matmul %23, %24, %cst_13 {dimension_numbers = #tpu.dot_dimension_numbers<[1], [1], [0], [0], [0, 0, 1, 0], [], []>} : vector<8x8xf32>, vector<8x8xf32>, vector<8x8xf32> -> vector<8x8xf32>
    %27 = arith.addf %26, %3 : vector<8x8xf32>
    %cst_14 = arith.constant dense<0xFF800000> : vector<8xf32>
    %28 = vector.multi_reduction <maximumf>, %27, %cst_14 [1] : vector<8x8xf32> to vector<8xf32>
    %29 = vector.shape_cast %28 : vector<8xf32> to vector<8x1xf32>
    %30 = vector.broadcast %29 : vector<8x1xf32> to vector<8x8xf32>
    %31 = arith.subf %27, %30 : vector<8x8xf32>
    %32 = math.exp %31 : vector<8x8xf32>
    %cst_15 = arith.constant dense<0.000000e+00> : vector<8xf32>
    %33 = vector.multi_reduction <add>, %32, %cst_15 [1] : vector<8x8xf32> to vector<8xf32>
    %34 = vector.shape_cast %33 : vector<8xf32> to vector<8x1xf32>
    %cst_16 = arith.constant dense<0.000000e+00> : vector<8x8xf32>
    %35 = tpu.matmul %32, %25, %cst_16 {dimension_numbers = #tpu.dot_dimension_numbers<[1], [0], [0], [1], [0, 0, 1, 1], [], []>} : vector<8x8xf32>, vector<8x8xf32>, vector<8x8xf32> -> vector<8x8xf32>
    %36 = tpu.reciprocal %34 {approx = true} : vector<8x1xf32> -> vector<8x1xf32>
    %37 = vector.broadcast %36 : vector<8x1xf32> to vector<8x8xf32>
    %38 = arith.mulf %35, %37 : vector<8x8xf32>
    %c0_17 = arith.constant 0 : index
    %c8 = arith.constant 8 : index
    %39 = vector.load %arg11[%c0_17, %c8] : memref<8x32xf32, #tpu.memory_space<vmem>>, vector<8x8xf32>
    tpu.vector_store %arg11[%c0_17, %c8], %38 {strides = array<i32>} : memref<8x32xf32, #tpu.memory_space<vmem>>, vector<8x8xf32>,
    %40 = vector.extract_strided_slice %5 {offsets = [0, 16], sizes = [8, 8], strides = [1, 1]} : vector<8x96xf32> to vector<8x8xf32>
    %41 = vector.extract_strided_slice %5 {offsets = [0, 48], sizes = [8, 8], strides = [1, 1]} : vector<8x96xf32> to vector<8x8xf32>
    %42 = vector.extract_strided_slice %5 {offsets = [0, 80], sizes = [8, 8], strides = [1, 1]} : vector<8x96xf32> to vector<8x8xf32>
    %cst_18 = arith.constant dense<0.000000e+00> : vector<8x8xf32>
    %43 = tpu.matmul %40, %41, %cst_18 {dimension_numbers = #tpu.dot_dimension_numbers<[1], [1], [0], [0], [0, 0, 1, 0], [], []>} : vector<8x8xf32>, vector<8x8xf32>, vector<8x8xf32> -> vector<8x8xf32>
    %44 = arith.addf %43, %3 : vector<8x8xf32>
    %cst_19 = arith.constant dense<0xFF800000> : vector<8xf32>
    %45 = vector.multi_reduction <maximumf>, %44, %cst_19 [1] : vector<8x8xf32> to vector<8xf32>
    %46 = vector.shape_cast %45 : vector<8xf32> to vector<8x1xf32>
    %47 = vector.broadcast %46 : vector<8x1xf32> to vector<8x8xf32>
    %48 = arith.subf %44, %47 : vector<8x8xf32>
    %49 = math.exp %48 : vector<8x8xf32>
    %cst_20 = arith.constant dense<0.000000e+00> : vector<8xf32>
    %50 = vector.multi_reduction <add>, %49, %cst_20 [1] : vector<8x8xf32> to vector<8xf32>
    %51 = vector.shape_cast %50 : vector<8xf32> to vector<8x1xf32>
    %cst_21 = arith.constant dense<0.000000e+00> : vector<8x8xf32>
    %52 = tpu.matmul %49, %42, %cst_21 {dimension_numbers = #tpu.dot_dimension_numbers<[1], [0], [0], [1], [0, 0, 1, 1], [], []>} : vector<8x8xf32>, vector<8x8xf32>, vector<8x8xf32> -> vector<8x8xf32>
    %53 = tpu.reciprocal %51 {approx = true} : vector<8x1xf32> -> vector<8x1xf32>
    %54 = vector.broadcast %53 : vector<8x1xf32> to vector<8x8xf32>
    %55 = arith.mulf %52, %54 : vector<8x8xf32>
    %c0_22 = arith.constant 0 : index
    %c16 = arith.constant 16 : index
    %56 = vector.load %arg11[%c0_22, %c16] : memref<8x32xf32, #tpu.memory_space<vmem>>, vector<8x8xf32>
    tpu.vector_store %arg11[%c0_22, %c16], %55 {strides = array<i32>} : memref<8x32xf32, #tpu.memory_space<vmem>>, vector<8x8xf32>,
    %57 = vector.extract_strided_slice %5 {offsets = [0, 24], sizes = [8, 8], strides = [1, 1]} : vector<8x96xf32> to vector<8x8xf32>
    %58 = vector.extract_strided_slice %5 {offsets = [0, 56], sizes = [8, 8], strides = [1, 1]} : vector<8x96xf32> to vector<8x8xf32>
    %59 = vector.extract_strided_slice %5 {offsets = [0, 88], sizes = [8, 8], strides = [1, 1]} : vector<8x96xf32> to vector<8x8xf32>
    %cst_23 = arith.constant dense<0.000000e+00> : vector<8x8xf32>
    %60 = tpu.matmul %57, %58, %cst_23 {dimension_numbers = #tpu.dot_dimension_numbers<[1], [1], [0], [0], [0, 0, 1, 0], [], []>} : vector<8x8xf32>, vector<8x8xf32>, vector<8x8xf32> -> vector<8x8xf32>
    %61 = arith.addf %60, %3 : vector<8x8xf32>
    %cst_24 = arith.constant dense<0xFF800000> : vector<8xf32>
    %62 = vector.multi_reduction <maximumf>, %61, %cst_24 [1] : vector<8x8xf32> to vector<8xf32>
    %63 = vector.shape_cast %62 : vector<8xf32> to vector<8x1xf32>
    %64 = vector.broadcast %63 : vector<8x1xf32> to vector<8x8xf32>
    %65 = arith.subf %61, %64 : vector<8x8xf32>
    %66 = math.exp %65 : vector<8x8xf32>
    %cst_25 = arith.constant dense<0.000000e+00> : vector<8xf32>
    %67 = vector.multi_reduction <add>, %66, %cst_25 [1] : vector<8x8xf32> to vector<8xf32>
    %68 = vector.shape_cast %67 : vector<8xf32> to vector<8x1xf32>
    %cst_26 = arith.constant dense<0.000000e+00> : vector<8x8xf32>
    %69 = tpu.matmul %66, %59, %cst_26 {dimension_numbers = #tpu.dot_dimension_numbers<[1], [0], [0], [1], [0, 0, 1, 1], [], []>} : vector<8x8xf32>, vector<8x8xf32>, vector<8x8xf32> -> vector<8x8xf32>
    %70 = tpu.reciprocal %68 {approx = true} : vector<8x1xf32> -> vector<8x1xf32>
    %71 = vector.broadcast %70 : vector<8x1xf32> to vector<8x8xf32>
    %72 = arith.mulf %69, %71 : vector<8x8xf32>
    %c0_27 = arith.constant 0 : index
    %c24 = arith.constant 24 : index
    %73 = vector.load %arg11[%c0_27, %c24] : memref<8x32xf32, #tpu.memory_space<vmem>>, vector<8x8xf32>
    tpu.vector_store %arg11[%c0_27, %c24], %72 {strides = array<i32>} : memref<8x32xf32, #tpu.memory_space<vmem>>, vector<8x8xf32>,
    %c0_28 = arith.constant 0 : index
    %c0_29 = arith.constant 0 : index
    %74 = vector.load %arg11[%c0_28, %c0_29] : memref<8x32xf32, #tpu.memory_space<vmem>>, vector<8x32xf32>
    %c0_30 = arith.constant 0 : index
    %c0_31 = arith.constant 0 : index
    %75 = vector.load %arg5[%c0_30, %c0_31] : memref<32x32xf32, #tpu.memory_space<vmem>>, vector<32x32xf32>
    %cst_32 = arith.constant dense<0.000000e+00> : vector<8x32xf32>
    %76 = tpu.matmul %74, %75, %cst_32 {dimension_numbers = #tpu.dot_dimension_numbers<[1], [0], [0], [1], [0, 0, 1, 1], [], []>} : vector<8x32xf32>, vector<32x32xf32>, vector<8x32xf32> -> vector<8x32xf32>
    %c0_33 = arith.constant 0 : index
    %c0_34 = arith.constant 0 : index
    %77 = vector.load %arg6[%c0_33, %c0_34] : memref<1x32xf32, #tpu.memory_space<vmem>>, vector<1x32xf32>
    %78 = vector.broadcast %77 : vector<1x32xf32> to vector<8x32xf32>
    %79 = arith.addf %76, %78 : vector<8x32xf32>
    %c0_35 = arith.constant 0 : index
    %c0_36 = arith.constant 0 : index
    %80 = vector.load %arg7[%c0_35, %c0_36] : memref<32x128xf32, #tpu.memory_space<vmem>>, vector<32x128xf32>
    %cst_37 = arith.constant dense<0.000000e+00> : vector<8x128xf32>
    %81 = tpu.matmul %79, %80, %cst_37 {dimension_numbers = #tpu.dot_dimension_numbers<[1], [0], [0], [1], [0, 0, 1, 1], [], []>} : vector<8x32xf32>, vector<32x128xf32>, vector<8x128xf32> -> vector<8x128xf32>
    %c0_38 = arith.constant 0 : index
    %c0_39 = arith.constant 0 : index
    %82 = vector.load %arg8[%c0_38, %c0_39] : memref<1x128xf32, #tpu.memory_space<vmem>>, vector<1x128xf32>
    %83 = vector.broadcast %82 : vector<1x128xf32> to vector<8x128xf32>
    %84 = arith.addf %81, %83 : vector<8x128xf32>
    %c0_40 = arith.constant 0 : index
    %c0_41 = arith.constant 0 : index
    %c0_42 = arith.constant 0 : index
    %85 = vector.load %arg9[%c0_40, %c0_41, %c0_42] : memref<1x8x128xf32, #tpu.memory_space<vmem>>, vector<1x8x128xf32>
    %86 = vector.shape_cast %85 : vector<1x8x128xf32> to vector<8x128xf32>
    %87 = vector.shape_cast %84 : vector<8x128xf32> to vector<1x8x128xf32>
    tpu.vector_store %arg9[%c0_40, %c0_41, %c0_42], %87 {strides = array<i32>} : memref<1x8x128xf32, #tpu.memory_space<vmem>>, vector<1x8x128xf32>,
    %cst_43 = arith.constant dense<0xFF800000> : vector<8xf32>
    %88 = vector.multi_reduction <maximumf>, %84, %cst_43 [1] : vector<8x128xf32> to vector<8xf32>
    %89 = vector.shape_cast %88 : vector<8xf32> to vector<8x1xf32>
    %90 = vector.broadcast %89 : vector<8x1xf32> to vector<8x128xf32>
    %91 = arith.subf %84, %90 : vector<8x128xf32>
    %92 = math.exp %91 : vector<8x128xf32>
    %cst_44 = arith.constant dense<0.000000e+00> : vector<8xf32>
    %93 = vector.multi_reduction <add>, %92, %cst_44 [1] : vector<8x128xf32> to vector<8xf32>
    %94 = vector.shape_cast %93 : vector<8xf32> to vector<8x1xf32>
    %95 = math.log %94 : vector<8x1xf32>
    %96 = arith.addf %95, %89 : vector<8x1xf32>
    %97 = tpu.iota {dimensions = array<i32: 1>} : vector<8x128xi32>
    %c0_45 = arith.constant 0 : index
    %c0_46 = arith.constant 0 : index
    %c0_47 = arith.constant 0 : index
    %98 = vector.load %arg3[%c0_45, %c0_46, %c0_47] : memref<1x8x1xi32, #tpu.memory_space<vmem>>, vector<1x8x1xi32>
    %99 = vector.shape_cast %98 : vector<1x8x1xi32> to vector<8x1xi32>
    %100 = vector.broadcast %99 : vector<8x1xi32> to vector<8x128xi32>
    %101 = arith.cmpi eq, %97, %100 : vector<8x128xi32>
    %cst_48 = arith.constant 0.000000e+00 : f32
    %102 = vector.broadcast %cst_48 : f32 to vector<8x128xf32>
    %103 = arith.select %101, %84, %102 : vector<8x128xi1>, vector<8x128xf32>
    %cst_49 = arith.constant dense<0.000000e+00> : vector<8xf32>
    %104 = vector.multi_reduction <add>, %103, %cst_49 [1] : vector<8x128xf32> to vector<8xf32>
    %105 = vector.shape_cast %104 : vector<8xf32> to vector<8x1xf32>
    %106 = arith.subf %96, %105 : vector<8x1xf32>
    %c0_50 = arith.constant 0 : index
    %c0_51 = arith.constant 0 : index
    %c0_52 = arith.constant 0 : index
    %107 = vector.load %arg10[%c0_50, %c0_51, %c0_52] : memref<1x8x1xf32, #tpu.memory_space<vmem>>, vector<1x8x1xf32>
    %108 = vector.shape_cast %107 : vector<1x8x1xf32> to vector<8x1xf32>
    %109 = vector.shape_cast %106 : vector<8x1xf32> to vector<1x8x1xf32>
    tpu.vector_store %arg10[%c0_50, %c0_51, %c0_52], %109 {strides = array<i32>} : memref<1x8x1xf32, #tpu.memory_space<vmem>>, vector<1x8x1xf32>,
    return
  }
  func.func @transform_0(%arg0: i32) -> (i32, i32, i32) {
    %c0_i32 = arith.constant 0 : i32
    %c0_i32_0 = arith.constant 0 : i32
    %c0_i32_1 = arith.constant 0 : i32
    return %arg0, %c0_i32, %c0_i32_0 : i32, i32, i32
  }
  func.func @transform_1(%arg0: i32) -> (i32, i32, i32) {
    %c0_i32 = arith.constant 0 : i32
    %c0_i32_0 = arith.constant 0 : i32
    %c0_i32_1 = arith.constant 0 : i32
    return %arg0, %c0_i32, %c0_i32_0 : i32, i32, i32
  }
  func.func @transform_2(%arg0: i32) -> (i32, i32, i32) {
    %c0_i32 = arith.constant 0 : i32
    %c0_i32_0 = arith.constant 0 : i32
    %c0_i32_1 = arith.constant 0 : i32
    return %arg0, %c0_i32, %c0_i32_0 : i32, i32, i32
  }
  func.func @transform_3(%arg0: i32) -> (i32, i32) {
    %c0_i32 = arith.constant 0 : i32
    %c0_i32_0 = arith.constant 0 : i32
    %c0_i32_1 = arith.constant 0 : i32
    return %c0_i32, %c0_i32_0 : i32, i32
  }
  func.func @transform_4(%arg0: i32) -> (i32, i32) {
    %c0_i32 = arith.constant 0 : i32
    %c0_i32_0 = arith.constant 0 : i32
    %c0_i32_1 = arith.constant 0 : i32
    return %c0_i32, %c0_i32_0 : i32, i32
  }
  func.func @transform_5(%arg0: i32) -> (i32, i32) {
    %c0_i32 = arith.constant 0 : i32
    %c0_i32_0 = arith.constant 0 : i32
    %c0_i32_1 = arith.constant 0 : i32
    return %c0_i32, %c0_i32_0 : i32, i32
  }
  func.func @transform_6(%arg0: i32) -> (i32, i32) {
    %c0_i32 = arith.constant 0 : i32
    %c0_i32_0 = arith.constant 0 : i32
    %c0_i32_1 = arith.constant 0 : i32
    return %c0_i32, %c0_i32_0 : i32, i32
  }
  func.func @transform_7(%arg0: i32) -> (i32, i32) {
    %c0_i32 = arith.constant 0 : i32
    %c0_i32_0 = arith.constant 0 : i32
    %c0_i32_1 = arith.constant 0 : i32
    return %c0_i32, %c0_i32_0 : i32, i32
  }
  func.func @transform_8(%arg0: i32) -> (i32, i32, i32) {
    %c0_i32 = arith.constant 0 : i32
    %c0_i32_0 = arith.constant 0 : i32
    %c0_i32_1 = arith.constant 0 : i32
    return %arg0, %c0_i32, %c0_i32_0 : i32, i32, i32
  }
  func.func @transform_9(%arg0: i32) -> (i32, i32, i32) {
    %c0_i32 = arith.constant 0 : i32
    %c0_i32_0 = arith.constant 0 : i32
    %c0_i32_1 = arith.constant 0 : i32
    return %arg0, %c0_i32, %c0_i32_0 : i32, i32, i32
  }
}

</mosaic_0001>

<bundles_post_ra>
// kernel: neural_empathy_forward.1
= control target key start
LH: loop header
LB: loop body
LE: loop exit
PB: predicated region body
PF: predicated region fallthrough
CT: control target
= control target key end

     0   :  { %15 = vsyncpa [#allocation4], 0  ;;  %s2281_s0 = inlined_call_operand.hbm [shape: f32[2,8,32], index: 0, kind: input, shape index: {}]   ;;  %s2282_s1 = inlined_call_operand.vmem [shape: f32[2,8,8], index: 1, kind: input, shape index: {}]   ;;  %s2283_s2 = inlined_call_operand.vmem [shape: s32[2,8,1], index: 2, kind: input, shape index: {}]   ;;  %s2284_s3 = inlined_call_operand.vmem [shape: f32[32,96], index: 3, kind: input, shape index: {}]   ;;  %s2285_s4 = inlined_call_operand.vmem [shape: f32[32,32], index: 4, kind: input, shape index: {}]   ;;  %s2286_s5 = inlined_call_operand.vmem [shape: f32[1,32], index: 5, kind: input, shape index: {}]   ;;  %s2287_s6 = inlined_call_operand.hbm [shape: f32[32,128], index: 6, kind: input, shape index: {}]   ;;  %s2288_s7 = inlined_call_operand.vmem [shape: f32[1,128], index: 7, kind: input, shape index: {}]   ;;  %s2289_s8 = inlined_call_operand.hbm [shape: f32[2,8,128], index: 8, kind: output, shape index: {0}]   ;;  %s2290_s9 = inlined_call_operand.vmem [shape: f32[2,8,1], index: 9, kind: output, shape index: {1}]  }
   0x1   :  { %17 = vsyncpa [#allocation4 + $0x1], 0 }
   0x2   :  { %18 = vsyncpa [#allocation7], 0 }
   0x3   :  { %19 = vsyncpa [#allocation5], 0 }
   0x4   :  { %21 = vsyncpa [#allocation5 + $0x1], 0  ;;  %s1967_s30 = smov 0   ;;  %s1969_s10 = smov 0  }
   0x5   :  { %s1971_s11 = smov 0   ;;  %s1973_s12 = smov 0  }
   0x6 LB: > { %s1988_s13 = sadd.s32 4294967295, %s1892_s12   ;;  %s1509_s14 = sadd.s32 4294967294, %s1892_s12   ;;  %s1892_s12 = sphi %s1973_s12, %s2313_s12   ;;  %s1888_s11 = sphi %s1971_s11, %s2316_s11   ;;  %s1884_s10 = sphi %s1969_s10, %s2315_s10   ;;  %s1880_s30 = sphi %s1967_s30, %s2314_s30  }
   0x7   : > { %p47_p0 = scmp.ne.s32.totalorder %s1884_s10, %s1880_s30  ;;  %p2291_p1 = scmp.eq.s32.totalorder %s1988_s13, 0 }
   0x8   : > { %p234_p3 = scmp.eq.s32.totalorder %s1509_s14, 1  ;;  %p1510_p5 = scmp.ge.s32.totalorder %s1892_s12, 1 }
   0x9   : > { %p1997_p4 = por %p2291_p1, %p47_p0  ;;  %p267_p7 = scmp.lt.s32.totalorder %s1892_s12, 3 }
   0xa   : > { %p2002_p6 = por %p234_p3, %p47_p0  ;;  %s1894_s18 = smov [#allocation6]  }
   0xb   : > { %s2297_s15 = scalar_select %p1997_p4, 1, 0 }
   0xc   : > { %s2298_s16 = scalar_select %p2002_p6, 1, 0 }
   0xd   : > { %p2007_p8 = pnand %p1510_p5, %p267_p7  ;;  %s288_s19 = sshll.u32 %s1894_s18, 4  ;;  %s2011_s19 = int_to_ptr.vmem [resolvable:$true] %s288_s19 }
   0xe   : > { %2299 = sst [smem:[#allocation12_spill]] %s2298_s16  ;;  %s2023_s21 = sadd.s32 1, %s1892_s12  }
   0xf   : > { %s2300_s17 = scalar_select %p2007_p8, 1, 0 }
  0x10   : > { %p1673_p9 = pneg %p2007_p8  ;;  %2302 = sst [smem:[#allocation13_spill]] %s2023_s21 }
  0x11   : > { %s34_s22 = sadd.s32 1, %s1888_s11  ;;  %s31_s23 = ssub.s32 %s1892_s12, %s2023_s21 }
  0x12   : > { %p2018_p11 = pnand %p1673_p9, %p2291_p1  ;;  %s1764_s26 = scalar_lea.hbm %s2287_s6, 512 }
  0x13   : > { %p1765_p12 = scmp.ne.s32.totalorder %s2287_s6, %s1764_s26  ;;  %p1771_p5 = scmp.lt.u32.totalorder %s1764_s26, %s2287_s6 }
  0x14   : > { %p1766_p13 = pneg %p2018_p11 }
  0x16   : > { %p1767_p0 = pnand %p1766_p13, %p1765_p12 }
  0x18   : > { %p1768_p3 = pneg %p1767_p0 }
  0x1a   : > { %p1773_p7 = pnand %p1771_p5, %p1768_p3 }
  0x1c   : > { %1776 = shalt.err (!%p1773_p7)
}
  0x1d   : > { %s1777_s18 = scalar_lea.vmem %s2011_s19, 512  ;;  %p1785_p2 = scmp.lt.s32.totalorder %s2011_s19, %s2011_s19 }
  0x1e   : > { %p1778_p9 = scmp.ne.s32.totalorder %s2011_s19, %s1777_s18  ;;  %p1786_p6 = scmp.lt.s32.totalorder %s1777_s18, %s1777_s18 }
  0x20   : > { %p1780_p10 = pnand %p1778_p9, %p1766_p13  ;;  %p1787_p4 = por %p1786_p6, %p1785_p2 }
  0x22   : > { %p1781_p1 = pneg %p1780_p10 }
  0x24   : > { %p1788_p8 = pnand %p1787_p4, %p1781_p1 }
  0x26   : > { %1791 = shalt.err (!%p1788_p8)
}
  0x27   : > { %s1895_s24 = smov 128   ;;  %s1896_s25 = smov 8  }
  0x28   : > { %1676 = dma.hbm_to_vmem [thread:$0]  (!%p2018_p11), %s2287_s6, 512, %s2011_s19, [#allocation7], %s1895_s24, %s1895_s24, %s1896_s25  }
  0x29   : > { %p32_p2 = scmp.eq.s32.totalorder %s31_s23, 0  ;;  %p41_p1 = scmp.ne.s32.totalorder %s1888_s11, %s1884_s10 }
  0x2a   : > { %p42_p4 = scmp.eq.s32.totalorder %s1892_s12, 0  ;;  %p1686_p6 = scmp.lt.s32.totalorder %s1892_s12, 2 }
  0x2b   : > { %s2054_s28 = scalar_select %p32_p2, %s1888_s11, %s34_s22  }
  0x2c   : > { %p43_p8 = por %p42_p4, %p41_p1  ;;  %p2303_p10 = scmp.eq.s32.totalorder %s1988_s13, 1 }
  0x2d   : > { %s305_s14 = sand.u32 1, %s1888_s11   ;;  %s1514_s18 = sshll.u32 %s1892_s12, 7 }
  0x2e   : > { %p2058_p12 = por %p2303_p10, %p41_p1  ;;  %s1513_s21 = sshll.u32 %s305_s14, 3 }
  0x2f   : > { %s2067_s26 = scalar_lea.hbm %s2281_s0, %s1514_s18  ;;  %s309_s19 = scalar_lea.vmem [#allocation3], %s1513_s21 }
  0x30   : > { %s316_s22 = sshll.u32 %s309_s19, 4  ;;  %p2069_p11 = pnand %p1686_p6, %p43_p8  ;;  %s2073_s22 = int_to_ptr.vmem [resolvable:$true] %s316_s22 }
  0x31   : > { %s306_s24 = scalar_lea.sflag [#allocation4], %s305_s14  ;;  %s1792_s25 = scalar_lea.hbm %s2067_s26, 128 }
  0x32   : > { %p1793_p13 = scmp.ne.s32.totalorder %s2067_s26, %s1792_s25  ;;  %p1794_p0 = pneg %p2069_p11 }
  0x33   : > { %s1797_s27 = scalar_lea.hbm %s2281_s0, 256  ;;  %p1798_p7 = scmp.lt.u32.totalorder %s2067_s26, %s2281_s0 }
  0x34   : > { %p1795_p3 = pnand %p1794_p0, %p1793_p13  ;;  %p1799_p9 = scmp.lt.u32.totalorder %s1797_s27, %s1792_s25 }
  0x35   : > { %p1801_p1 = scmp.lt.u32.totalorder %s1792_s25, %s2067_s26 }
  0x36   : > { %p1796_p5 = pneg %p1795_p3  ;;  %p1800_p2 = por %p1799_p9, %p1798_p7 }
  0x38   : > { %p1802_p4 = por %p1801_p1, %p1800_p2 }
  0x3a   : > { %p1803_p6 = pnand %p1802_p4, %p1796_p5 }
  0x3c   : > { %1806 = shalt.err (!%p1803_p6)
}
  0x3d   : > { %s1807_s14 = scalar_lea.vmem %s2073_s22, 128  ;;  %s1897_s19 = smov [#allocation3]  }
  0x3e   : > { %p1808_p8 = scmp.ne.s32.totalorder %s2073_s22, %s1807_s14  ;;  %s1812_s16 = sshll.u32 %s1897_s19, 4  ;;  %s1813_s16 = int_to_ptr.vmem [resolvable:$false] %s1812_s16 }
  0x3f   : > { %s1814_s21 = scalar_lea.vmem %s1813_s16, 256  ;;  %p1815_p3 = scmp.lt.s32.totalorder %s2073_s22, %s1813_s16 }
  0x40   : > { %p1810_p10 = pnand %p1808_p8, %p1794_p0  ;;  %p1816_p7 = scmp.lt.s32.totalorder %s1814_s21, %s1807_s14 }
  0x42   : > { %p1811_p13 = pneg %p1810_p10  ;;  %p1817_p9 = por %p1816_p7, %p1815_p3 }
  0x44   : > { %p1818_p2 = pnand %p1817_p9, %p1811_p13 }
  0x46   : > { %1821 = shalt.err (!%p1818_p2)
}
  0x47   : > { %1680 = dma.hbm_to_vmem [thread:$0]  (!%p2069_p11), %s2067_s26, 128, %s2073_s22, %s306_s24  }
  0x48   : > { %p2306_p5 = scmp.ne.s32.totalorder %s2300_s17, 0 }
  0x49   : > { %s2103_s25 = sand.u32 (!%p2306_p5), 1, %s1884_s10   ;;  %p2307_p0 = scmp.ne.s32.totalorder (!%p2306_p5), %s2297_s15, 0 }
  0x4a   : > { %339 = sbr.rel (%p2306_p5) target bundleno = 1932 (0x78c), region = 52  ;;  %s1516_s27 = sshll.u32 (!%p2306_p5), %s2103_s25, 3 }
  0x4b   : > { %s342_s18 = scalar_lea.sflag (!%p2306_p5), [#allocation4], %s2103_s25  ;;  %s345_s20 = scalar_lea.vmem (!%p2306_p5), [#allocation3], %s1516_s27 }
  0x51   : > { %1867 = dma.done.wait (%p2307_p0), %s342_s18, 128  }
  0x52   : > { %1869 = vsyncadd (%p2307_p0), %s342_s18, 4294967168  ;;  %p2308_p11 = scmp.eq.s32.totalorder %s1988_s13, 0 }
  0x54   : > { %1871 = dma.done.wait (%p2308_p11), [#allocation7], 512   ;;  %p2309_p1 = pmov %p2308_p11 }
  0x55   : > { %v1898_v0 = vmov 0.0|0.0   ;;  %vm1899_vm0 = vmmov 0   ;;  %v1900_v1 = vmov 0.0   ;;  %v410_v2 = vld [vmem:[%s2284_s3] sm:$0xff]  ;;  %v411_v3 = vld [vmem:[%s2284_s3 + $0x8] sm:$0xff]  ;;  %v412_v4 = vld [vmem:[%s2284_s3 + $0x10] sm:$0xff] }
  0x56   : > { %1873 = vsyncadd (%p2309_p1), [#allocation7], 4294966784  ;;  %1647 = vmatprep.subr.bf16.mxu0 %v1898_v0  ;;  %1582 = vmatprep.mubr.msk.f32.mxu0 %vm1899_vm0, %v1900_v1  ;;  %v1648_v5 = vpack.c.bf16 %v411_v3, %v410_v2  ;;  %v413_v6 = vld [vmem:[%s2284_s3 + $0x18] sm:$0xff]  ;;  %v408_v8 = vld [vmem:[%s345_s20] sm:$0xff]  ;;  %vm414_vm1 = vcmask 261120   ;;  %s1901_s16 = smov 120  }
  0x57   : > { %1585 = vmatprep.subr.mxu1 %v1900_v1  ;;  %1587 = vmatprep.mubr.msk.f32.mxu1 %vm1899_vm0, %v1900_v1  ;;  %v1651_v7 = vpack.c.bf16 %v413_v6, %v412_v4  ;;  %s1902_s21 = smov 96   ;;  %s1903_s18 = smov 80   ;;  %vm491_vm2 = vcmask 64512   ;;  %vm823_vm3 = vcmask 130112   ;;  %vm994_vm4 = vcmask 195712  }
  0x58   : > { %1649 = vmatpush3.bf16.msra.mxu0 %v1648_v5  ;;  %s1904_s20 = smov 88   ;;  %s1905_s15 = smov 72   ;;  %vm1165_vm5 = vcmask 261312  }
  0x59   : > { %1650 = vmatprep.subr.bf16.mxu0 %v1898_v0  ;;  %s1906_s17 = smov 112   ;;  %s1907_s26 = smov 104  }
  0x5a   : > { %p396_p4 = scmp.lt.s32.totalorder %s1988_s13, 1 }
  0x5c   : > { %1652 = vmatpush3.bf16.msra.mxu0 %v1651_v7  ;;  %s397_s22 = scalar_select %p396_p4, %s1988_s13, 1 }
  0x5d   : > { %1595 = vmatprep.subr.mxu0 %v1900_v1 }
  0x5e   : > { %s2172_s23 = sshll.u32 %s397_s22, 3  ;;  %s1916_s22 = smov [#allocation8]  }
  0x5f   : > { %1583 = vmatmul.mubr.msk.f32.vlgmr.msra.gmra.mrb[0].mxu0 %vm414_vm1, %v408_v8  ;;  %s399_s19 = scalar_lea.vmem %s2282_s1, %s2172_s23  ;;  %s1826_s24 = sshll.u32 %s1916_s22, 4  ;;  %s1827_s24 = int_to_ptr.vmem [resolvable:$false] %s1826_s24 }
  0x60   : > { %1597 = vmatprep.mubr.msk.f32.mxu0 %vm1899_vm0, %v1900_v1  ;;  %v409_v18 = vld [vmem:[%s399_s19] sm:$0xff]  ;;  %s1828_s14 = scalar_lea.vmem %s1827_s24, 256 }
 0x132   : > { %v2140_v9 = vpop.f32.mrb[0].mxu0 }
 0x133   : > { %654 = vrot.lane.b32.xlu1 %v2140_v9, %s1901_s16  ;;  %489 = vrot.lane.b32.xlu0 %v2140_v9, %s1902_s21  ;;  %v1584_v10 = vpop.f32.mrb[1].mxu0  ;;  %s1908_s16 = smov 56   ;;  %s1909_s21 = smov 64  }
 0x137   : > { %827 = vrot.lane.b32.xlu1 %v2140_v9, %s1903_s18  ;;  %656 = vrot.lane.b32.xlu0 %v2140_v9, %s1904_s20  ;;  %s1910_s18 = smov 40   ;;  %s1911_s20 = smov 48  }
 0x13b   : > { %998 = vrot.lane.b32.xlu1 %v2140_v9, %s1905_s15  ;;  %825 = vrot.lane.b32.xlu0 %v2140_v9, %s1906_s17  ;;  %s1912_s15 = smov 8  }
 0x13f   : > { %996 = vrot.lane.b32.xlu0 %v2140_v9, %s1907_s26  ;;  %s403_s26 = scalar_lea.vmem %s2283_s2, %s2172_s23 }
 0x1a5   : > { %v655_v11 = vpop.permute.xlu1 %654  ;;  %v490_v12 = vpop.permute.xlu0 %489 }
 0x1a6   : > { %1586 = vmatpush3.xpose.msk.msra.mxu1 %vm491_vm2, %v490_v12 }
 0x1a7   : > { %1590 = vmatprep.subr.mxu1 %v1900_v1 }
 0x1a9   : > { %1588 = vmatmul.mubr.msk.f32.vlgmr.msra.gmra.mrb[0].mxu1 %vm491_vm2, %v2140_v9  ;;  %v657_v13 = vpop.permute.xlu0 %656  ;;  %v828_v14 = vpop.permute.xlu1 %827 }
 0x1aa   : > { %1596 = vmatpush3.xpose.msk.msra.mxu0 %vm491_vm2, %v657_v13  ;;  %1592 = vmatprep.mubr.msk.f32.mxu1 %vm1899_vm0, %v1900_v1  ;;  %v1170_v13 = vld [vmem:[%s2285_s4 + $0x10] sm:$0xff] }
 0x1ab   : > { %1605 = vmatprep.subr.mxu0 %v1900_v1 }
 0x1ad   : > { %1598 = vmatmul.mubr.msk.f32.vlgmr.msra.gmra.mrb[2].mxu0 %vm491_vm2, %v655_v11  ;;  %v826_v15 = vpop.permute.xlu0 %825  ;;  %v999_v16 = vpop.permute.xlu1 %998 }
 0x1ae   : > { %1606 = vmatpush3.xpose.msk.msra.mxu0 %vm491_vm2, %v828_v14  ;;  %1607 = vmatprep.mubr.msk.f32.mxu0 %vm1899_vm0, %v1900_v1  ;;  %v1171_v14 = vld [vmem:[%s2285_s4 + $0x18] sm:$0xff] }
 0x1af   : > { %1615 = vmatprep.subr.mxu0 %v1900_v1 }
 0x1b1   : > { %1608 = vmatmul.mubr.msk.f32.vlgmr.msra.gmra.mrb[4].mxu0 %vm491_vm2, %v826_v15  ;;  %v997_v17 = vpop.permute.xlu0 %996 }
 0x1b2   : > { %1616 = vmatpush3.xpose.msk.msra.mxu0 %vm491_vm2, %v999_v16  ;;  %1617 = vmatprep.mubr.msk.f32.mxu0 %vm1899_vm0, %v1900_v1 }
 0x1b3   : > { %1653 = vmatprep.subr.bf16.mxu0 %v1898_v0 }
 0x1b5   : > { %1618 = vmatmul.mubr.msk.f32.vlgmr.msra.gmra.mrb[6].mxu0 %vm491_vm2, %v997_v17  ;;  %v1657_v17 = vpack.c.bf16 %v1171_v14, %v1170_v13 }
 0x1b6   : > { %1633 = vmatprep.mubr.msk.f32.mxu0 %vm1899_vm0, %v1900_v1 }
 0x27c   : > { %v562_v19 = vpop.f32.mrb[0].mxu1 }
 0x27d   : > { %v563_v20 = vadd.f32 %v562_v19, %v409_v18  ;;  %v1589_v21 = vpop.f32.mrb[1].mxu1  ;;  %v1253_v19 = vld [vmem:[#allocation6 + $0x8] sm:$0xff] }
 0x27f   : > { %v566_v22 = vsel %vm491_vm2, %v563_v20, -inf }
 0x280   : > { %567 = vmax.xlane.f32.xlu1 %v566_v22  ;;  %v728_v23 = vpop.f32.mrb[2].mxu0 }
 0x281   : > { %v729_v24 = vadd.f32 %v728_v23, %v409_v18  ;;  %v1599_v25 = vpop.f32.mrb[3].mxu0 }
 0x283   : > { %v732_v26 = vsel %vm491_vm2, %v729_v24, -inf }
 0x284   : > { %733 = vmax.xlane.f32.xlu0 %v732_v26  ;;  %v899_v27 = vpop.f32.mrb[4].mxu0 }
 0x285   : > { %v900_v28 = vadd.f32 %v899_v27, %v409_v18  ;;  %v1609_v29 = vpop.f32.mrb[5].mxu0 }
 0x286   : > { %v1254_v29 = vld [vmem:[#allocation6 + $0x10] sm:$0xff] }
 0x287   : > { %v903_v30 = vsel %vm491_vm2, %v900_v28, -inf }
 0x288   : > { %904 = vmax.xlane.f32.xlu0 %v903_v30  ;;  %v1070_v31 = vpop.f32.mrb[6].mxu0  ;;  %v1255_v30 = vld [vmem:[#allocation6 + $0x18] sm:$0xff] }
 0x289   : > { %v1619_v32 = vpop.f32.mrb[7].mxu0  ;;  %v1071_v33 = vadd.f32 %v1070_v31, %v409_v18  ;;  %v1252_v18 = vld [vmem:[#allocation6] sm:$0xff]  ;;  %v1663_v31 = vpack.c.bf16 %v1255_v30, %v1254_v29 }
 0x28a   : > { %v1349_v32 = vld [vmem:[%s403_s26] sm:$0xff]  ;;  %s1361_s26 = scalar_lea.sflag [#allocation5], %s2103_s25 }
 0x28b   : > { %v1074_v34 = vsel %vm491_vm2, %v1071_v33, -inf }
 0x291   : > { %741 = vrot.lane.b32.xlu1 %v2140_v9, %s1908_s16  ;;  %s389_s16 = scalar_lea.vmem [#allocation8], %s1516_s27 }
 0x29e   : > { %575 = vrot.lane.b32.xlu0 %v2140_v9, %s1909_s21  ;;  %s1540_s21 = sshll.u32 %s1988_s13, 7 }
 0x29f   : > { %s2239_s17 = scalar_lea.hbm %s2289_s8, %s1540_s21 }
 0x2a2   : > { %1083 = vrot.lane.b32.xlu0 %v2140_v9, %s1910_s18  ;;  %s1913_s18 = smov 16  }
 0x2b5   : > { %1075 = vmax.xlane.f32.xlu1 %v1074_v34 }
 0x2c6   : > { %912 = vrot.lane.b32.xlu1 %v2140_v9, %s1911_s20  ;;  %v1169_v9 = vld [vmem:[%s2285_s4 + $0x8] sm:$0xff]  ;;  %s1914_s20 = smov 24  }
 0x30d   : > { %v568_v35 = vpop.xlane.xlu1 %567 }
 0x30e   : > { %v569_v36 = vsub.f32 %v563_v20, %v568_v35  ;;  %v1660_v20 = vpack.c.bf16 %v1253_v19, %v1252_v18 }
 0x310   : > { %v570_v37 = vmul.f32 1.442695, %v569_v36 }
 0x311   : > { %v734_v38 = vpop.xlane.xlu0 %733  ;;  %v742_v46 = vpop.permute.xlu1 %741 }
 0x312   : > { %1744 = vpow2.f32 %v570_v37  ;;  %v735_v39 = vsub.f32 %v729_v24, %v734_v38  ;;  %v1347_v37 = vlaneseq  ;;  %v1537_v38 = vld [vmem:[%s2288_s7] ss:$0 sm:$0xff] }
 0x314   : > { %v736_v40 = vmul.f32 1.442695, %v735_v39  ;;  %v1348_v39 = vand.u32 127, %v1347_v37 }
 0x315   : > { %v905_v41 = vpop.xlane.xlu0 %904 }
 0x316   : > { %1746 = vpow2.f32 %v736_v40  ;;  %v906_v42 = vsub.f32 %v900_v28, %v905_v41 }
 0x318   : > { %v907_v43 = vmul.f32 1.442695, %v906_v42 }
 0x319   : > { %v576_v44 = vpop.permute.xlu0 %575 }
 0x31a   : > { %1748 = vpow2.f32 %v907_v43  ;;  %1591 = vmatpush3.msra.mxu1 %v576_v44 }
 0x31b   : > { %1600 = vmatprep.subr.mxu1 %v1900_v1 }
 0x31c   : > { %v1745_v45 = vpop.eup %1744 }
 0x31d   : > { %1593 = vmatmul.mubr.msk.f32.vlgmr.msra.gmra.mrb[2].mxu1 %vm491_vm2, %v1745_v45  ;;  %v572_v51 = vsel %vm491_vm2, %v1745_v45, 0.0  ;;  %v1084_v56 = vpop.permute.xlu0 %1083 }
 0x31e   : > { %1601 = vmatpush3.msra.mxu1 %v742_v46  ;;  %1602 = vmatprep.mubr.msk.f32.mxu1 %vm1899_vm0, %v1900_v1 }
 0x31f   : > { %1610 = vmatprep.subr.mxu1 %v1900_v1 }
 0x320   : > { %v1747_v47 = vpop.eup %1746 }
 0x321   : > { %1603 = vmatmul.mubr.msk.f32.vlgmr.msra.gmra.mrb[4].mxu1 %vm491_vm2, %v1747_v47  ;;  %v738_v48 = vsel %vm491_vm2, %v1747_v47, 0.0 }
 0x322   : > { %739 = vadd.xlane.f32.xlu1 %v738_v48  ;;  %1612 = vmatprep.mubr.msk.f32.mxu1 %vm1899_vm0, %v1900_v1 }
 0x324   : > { %v1749_v49 = vpop.eup %1748 }
 0x325   : > { %v909_v50 = vsel %vm491_vm2, %v1749_v49, 0.0 }
 0x326   : > { %910 = vadd.xlane.f32.xlu0 %v909_v50  ;;  %573 = vadd.xlane.f32.xlu1 %v572_v51 }
 0x342   : > { %v1076_v52 = vpop.xlane.xlu1 %1075 }
 0x343   : > { %v1077_v53 = vsub.f32 %v1071_v33, %v1076_v52  ;;  %v1535_v33 = vld [vmem:[%s2286_s5] ss:$0 sm:$0xff] }
 0x345   : > { %v1078_v54 = vmul.f32 1.442695, %v1077_v53 }
 0x346   : > { %v913_v55 = vpop.permute.xlu1 %912 }
 0x347   : > { %1750 = vpow2.f32 %v1078_v54  ;;  %1611 = vmatpush3.msra.mxu1 %v913_v55 }
 0x348   : > { %1613 = vmatmul.mubr.msk.f32.vlgmr.msra.gmra.mrb[6].mxu1 %vm491_vm2, %v1749_v49  ;;  %1620 = vmatprep.subr.mxu1 %v1900_v1 }
 0x349   : > { %1621 = vmatpush3.msra.mxu1 %v1084_v56  ;;  %1622 = vmatprep.mubr.msk.f32.mxu1 %vm1899_vm0, %v1900_v1 }
 0x34a   : > { %1659 = vmatprep.subr.bf16.mxu1 %v1898_v0 }
 0x351   : > { %v1751_v57 = vpop.eup %1750 }
 0x352   : > { %1623 = vmatmul.mubr.msk.f32.vlgmr.msra.gmra.mrb[8].mxu1 %vm491_vm2, %v1751_v57  ;;  %v1080_v58 = vsel %vm491_vm2, %v1751_v57, 0.0 }
 0x353   : > { %1081 = vadd.xlane.f32.xlu0 %v1080_v58  ;;  %1644 = vmatprep.mubr.msk.f32.mxu1 %vm1899_vm0, %v1900_v1  ;;  %v1168_v1 = vld [vmem:[%s2285_s4] sm:$0xff] }
 0x354   : > { %v1654_v12 = vpack.c.bf16 %v1169_v9, %v1168_v1  ;;  %1661 = vmatpush3.bf16.msra.mxu1 %v1660_v20 }
 0x355   : > { %1662 = vmatprep.subr.bf16.mxu1 %v1898_v0 }
 0x356   : > { %1655 = vmatpush3.bf16.msra.mxu0 %v1654_v12 }
 0x357   : > { %1656 = vmatprep.subr.bf16.mxu0 %v1898_v0  ;;  %v1915_v0 = vmov 0  }
 0x358   : > { %1664 = vmatpush3.bf16.msra.mxu1 %v1663_v31  ;;  %1742 = vset.pattern.permute.xlu1 %v1915_v0 }
 0x359   : > { %1743 = vset.pattern.permute.xlu0 %v1915_v0 }
 0x35a   : > { %1658 = vmatpush3.bf16.msra.mxu0 %v1657_v17 }
 0x3af   : > { %v740_v59 = vpop.xlane.xlu1 %739 }
 0x3b3   : > { %v574_v60 = vpop.xlane.xlu1 %573  ;;  %v911_v7 = vpop.xlane.xlu0 %910 }
 0x3b4   : > { %1752 = vrcp.f32 %v574_v60 }
 0x3b5   : > { %1754 = vrcp.f32 %v740_v59 }
 0x3b6   : > { %1756 = vrcp.f32 %v911_v7 }
 0x3be   : > { %v1753_v61 = vpop.eup %1752 }
 0x3bf   : > { %v1755_v3 = vpop.eup %1754 }
 0x3c0   : > { %v1757_v10 = vpop.eup %1756 }
 0x3e0   : > { %v1082_v8 = vpop.xlane.xlu0 %1081 }
 0x3e1   : > { %1758 = vrcp.f32 %v1082_v8 }
 0x3eb   : > { %v1759_v21 = vpop.eup %1758 }
 0x3f0   : > { %v647_v62 = vpop.f32.mrb[2].mxu1 }
 0x3f1   : > { %v652_v63 = vmul.f32 %v1753_v61, %v647_v62  ;;  %v1594_v2 = vpop.f32.mrb[3].mxu1 }
 0x3f3   : > { %653 = vst.msk [vmem:[#allocation2] sm:$0xff] %vm491_vm2, %v652_v63 }
 0x3f4   : > { %v813_v4 = vpop.f32.mrb[4].mxu1 }
 0x3f5   : > { %v818_v5 = vmul.f32 %v1755_v3, %v813_v4  ;;  %v1604_v6 = vpop.f32.mrb[5].mxu1 }
 0x3f7   : > { %820 = vrot.lane.b32.xlu0 %v818_v5, %s1912_s15 }
 0x41b   : > { %v984_v11 = vpop.f32.mrb[6].mxu1 }
 0x41c   : > { %v989_v15 = vmul.f32 %v1757_v10, %v984_v11  ;;  %v1614_v16 = vpop.f32.mrb[7].mxu1 }
 0x41e   : > { %991 = vrot.lane.b32.xlu1 %v989_v15, %s1913_s18  ;;  %s1378_s18 = sshll.u32 %s389_s16, 4  ;;  %s1379_s18 = int_to_ptr.vmem [resolvable:$true] %s1378_s18 }
 0x41f   : > { %s1822_s27 = scalar_lea.vmem %s1379_s18, 128  ;;  %p1829_p13 = scmp.lt.s32.totalorder %s1379_s18, %s1827_s24 }
 0x420   : > { %p1823_p6 = scmp.ne.s32.totalorder %s1379_s18, %s1822_s27  ;;  %p1830_p3 = scmp.lt.s32.totalorder %s1828_s14, %s1822_s27 }
 0x422   : > { %p1824_p8 = pnand %p1823_p6, %p2058_p12  ;;  %p1831_p7 = por %p1830_p3, %p1829_p13 }
 0x424   : > { %p1825_p10 = pneg %p1824_p8 }
 0x425   : > { %v1155_v22 = vpop.f32.mrb[8].mxu1 }
 0x426   : > { %v1160_v23 = vmul.f32 %v1759_v21, %v1155_v22  ;;  %v1624_v24 = vpop.f32.mrb[9].mxu1  ;;  %p1832_p9 = pnand %p1831_p7, %p1825_p10 }
 0x428   : > { %1162 = vrot.lane.b32.xlu1 %v1160_v23, %s1914_s20 }
 0x42c   : > { %1351 = vperm.xlu1 %1742, %v1349_v32  }
 0x469   : > { %v821_v25 = vpop.permute.xlu0 %820 }
 0x46a   : > { %824 = vst.msk [vmem:[#allocation2] sm:$0xff] %vm823_vm3, %v821_v25 }
 0x490   : > { %v992_v26 = vpop.permute.xlu1 %991 }
 0x491   : > { %995 = vst.msk [vmem:[#allocation2] sm:$0xff] %vm994_vm4, %v992_v26 }
 0x49a   : > { %v1163_v27 = vpop.permute.xlu1 %1162 }
 0x49b   : > { %1166 = vst.msk [vmem:[#allocation2] sm:$0xff] %vm1165_vm5, %v1163_v27 }
 0x4a2   : > { %v1167_v28 = vld [vmem:[#allocation2] sm:$0xff] }
 0x4a3   : > { %1634 = vmatmul.mubr.msk.f32.vlgmr.msra.gmra.mrb[8].mxu0 %vm414_vm1, %v1167_v28 }
 0x4ab   : > { %v1352_v41 = vpop.permute.xlu1 %1351 }
 0x4ac   : > { %vm1353_vm6 = vcmp.eq.s32.totalorder %v1348_v39, %v1352_v41 }
 0x576   : > { %v1248_v34 = vpop.f32.mrb[8].mxu0 }
 0x577   : > { %v1249_v35 = vadd.f32 %v1535_v33, %v1248_v34  ;;  %v1635_v36 = vpop.f32.mrb[9].mxu0 }
 0x579   : > { %1645 = vmatmul.mubr.msk.f32.vlgmr.msra.gmra.mrb[10].mxu1 %vm414_vm1, %v1249_v35 }
 0x64c   : > { %v1332_v40 = vpop.f32.mrb[10].mxu1 }
 0x64d   : > { %v1333_v42 = vadd.f32 %v1537_v38, %v1332_v40  ;;  %v1646_v43 = vpop.f32.mrb[11].mxu1 }
 0x64f   : > { %1337 = vmax.xlane.f32.xlu0 %v1333_v42  ;;  %1336 = vst [vmem:[%s389_s16] sm:$0xff] %v1333_v42  ;;  %v1354_v44 = vsel %vm1353_vm6, %v1333_v42, 0.0 }
 0x653   : > { %1355 = vadd.xlane.f32.xlu0 %v1354_v44 }
 0x6dc   : > { %v1338_v45 = vpop.xlane.xlu0 %1337 }
 0x6dd   : > { %v1339_v46 = vsub.f32 %v1333_v42, %v1338_v45 }
 0x6df   : > { %v1340_v47 = vmul.f32 1.442695, %v1339_v46 }
 0x6e1   : > { %1760 = vpow2.f32 %v1340_v47 }
 0x6eb   : > { %v1761_v48 = vpop.eup %1760 }
 0x6ec   : > { %1342 = vadd.xlane.f32.xlu1 %v1761_v48 }
 0x6ed   : > { %1835 = shalt.err (!%p1832_p9)
}
 0x6ee   : > { %s1836_s13 = scalar_lea.hbm %s2239_s17, 128  ;;  %s1840_s16 = scalar_lea.hbm %s2289_s8, 256 }
 0x6ef   : > { %p1837_p2 = scmp.ne.s32.totalorder %s2239_s17, %s1836_s13  ;;  %p1841_p11 = scmp.lt.u32.totalorder %s2239_s17, %s2289_s8 }
 0x6f0   : > { %p1842_p1 = scmp.lt.u32.totalorder %s1840_s16, %s1836_s13  ;;  %p1844_p6 = scmp.lt.u32.totalorder %s1836_s13, %s2239_s17 }
 0x6f1   : > { %p1838_p5 = pnand %p1837_p2, %p2058_p12 }
 0x6f2   : > { %p1843_p4 = por %p1842_p1, %p1841_p11 }
 0x6f3   : > { %p1839_p0 = pneg %p1838_p5 }
 0x6f4   : > { %p1845_p8 = por %p1844_p6, %p1843_p4 }
 0x6f6   : > { %p1846_p10 = pnand %p1845_p8, %p1839_p0 }
 0x6f8   : > { %1849 = shalt.err (!%p1846_p10)
}
 0x6f9   : > { %1671 = dma.vmem_to_hbm [thread:$0]  (%p2058_p12), %s1379_s18, 128, %s2239_s17, %s1361_s26   ;;  %v1356_v53 = vpop.xlane.xlu0 %1355  ;;  %vm1358_vm7 = vcmask 7168  }
 0x6fa   : > { %s407_s22 = scalar_lea.vmem %s2290_s9, %s2172_s23 }
 0x779   : > { %v1343_v49 = vpop.xlane.xlu1 %1342 }
 0x77a   : > { %1762 = vlog2.f32 %v1343_v49 }
 0x784   : > { %v1763_v50 = vpop.eup %1762 }
 0x785   : > { %v1345_v51 = vmul.f32 0.6931472, %v1763_v50 }
 0x787   : > { %v1346_v52 = vadd.f32 %v1345_v51, %v1338_v45 }
 0x789   : > { %v1357_v54 = vsub.f32 %v1346_v52, %v1356_v53 }
 0x78b   : > { %1359 = vst.msk [vmem:[%s407_s22] sm:$0xff] %vm1358_vm7, %v1357_v54 }
 0x78c PF: > { %s2310_s24 = sld [smem:[#allocation12_spill]]  ;;  %s1393_s29 = sand.u32 1, %s1880_s30  }
 0x78d   : > { %p2312_p12 = scmp.ge.s32.totalorder %s1892_s12, 2  ;;  %s1394_s18 = scalar_lea.sflag [#allocation5], %s1393_s29 }
 0x792   : > { %p2311_p13 = scmp.ne.s32.totalorder %s2310_s24, 0 }
 0x794   : > { %p1682_p3 = pnand %p2312_p12, %p2311_p13 }
 0x796   : > { %1875 = dma.done.wait (!%p1682_p3), %s1394_s18, 128  }
 0x797   : > { %1877 = vsyncadd (!%p1682_p3), %s1394_s18, 4294967168  ;;  %s2313_s12 = sld [smem:[#allocation13_spill]]  ;;  %s2314_s30 = smov %s1884_s10 }
 0x798   : > { %s2315_s10 = smov %s1888_s11  ;;  %s2316_s11 = smov %s2054_s28 }
 0x79d   : > { %p24_p7 = scmp.ge.s32.totalorder %s2313_s12, 4  }
 0x79f   :  { %26 = sbr.rel (!%p24_p7) target bundleno = 6 (0x6), region = 119 }
 0x7a6   :  { %1406 = vsyncpa [#allocation4], 1 }
 0x7a7   :  { %1408 = vsyncpa [#allocation4 + $0x1], 1 }
 0x7a8   :  { %1409 = vsyncpa [#allocation7], 1 }
 0x7a9   :  { %1410 = vsyncpa [#allocation5], 1 }
 0x7aa   :  { %1412 = vsyncpa [#allocation5 + $0x1], 1 }

</bundles_post_ra>
